<compile_context>
chip_gen: v7x
topology: tpu7x:2x2x1
jax: 0.10.0
libtpu: 0.0.40
codegen_flags: <defaults>
</compile_context>

<pallas_src>
import jax
import jax.numpy as jnp
from jax.experimental import pallas as pl
from jax.experimental.pallas import tpu as pltpu

# ---- constants from NerfDiff.__init__ / forward -----------------------------
IMAGENET_MEAN = (0.485, 0.456, 0.406)
IMAGENET_STD = (0.229, 0.224, 0.225)
LAMBDA_RGB_FIRST = 0.01
LAMBDA_RGB_OTHER = 1.0
LAMBDA_OPACITY = 0.001
LAMBDA_DIFFUSION = 1.0


# =============================================================================
# tile-size heuristics (keep blocks ~1-4 MiB, always legal for (8,128) tiling)
# =============================================================================
def _pick_sample_tile(N, per_sample_bytes, budget=4 << 20):
    """Largest divisor of N that keeps a block under `budget` (and grid >= 2)."""
    cap = max(1, N // 2)
    best = 1
    for d in range(1, N + 1):
        if N % d == 0 and d <= cap and d * per_sample_bytes <= budget:
            best = d
    return best


def _pick_row_tile(H, per_row_bytes, budget=2 << 20):
    """Largest multiple-of-8 divisor of H under the VMEM budget (else H)."""
    cands = [d for d in range(8, H + 1, 8) if H % d == 0]
    if not cands:
        return H
    cap = max(8, H // 2)
    best = cands[0]
    for d in cands:
        if d <= cap and d * per_row_bytes <= budget:
            best = d
    return best


# =============================================================================
# Kernel 1: per-sample preprocessing (elementwise hot path)
# =============================================================================
def _preprocess_kernel(scale_ref, img_ref, noise_ref, tgt_ref, imgtp_ref):
    nb = img_ref.shape[0]                 # samples per block (static)
    n0 = pl.program_id(0) * nb            # base sample index of this block

    img = img_ref[...]                    # (nb, 3, H, W)
    tgt = 0.5 * (img + 1.0)               # targets = 0.5*(img+1)
    tgt_ref[...] = tgt

    # per-channel ImageNet normalization, built from splat constants + iota
    cidx = jax.lax.broadcasted_iota(jnp.int32, img.shape, 1)
    mean = jnp.where(cidx == 0, IMAGENET_MEAN[0],
                     jnp.where(cidx == 1, IMAGENET_MEAN[1], IMAGENET_MEAN[2]))
    inv_std = jnp.where(cidx == 0, 1.0 / IMAGENET_STD[0],
                        jnp.where(cidx == 1, 1.0 / IMAGENET_STD[1],
                                  1.0 / IMAGENET_STD[2]))

    # per-sample noise scale (SMEM scalars) expanded over the block
    sidx = jax.lax.broadcasted_iota(jnp.int32, img.shape, 0)
    stile = jnp.zeros(img.shape, jnp.float32)
    for i in range(nb):                   # static, nb small
        stile = jnp.where(sidx == i, scale_ref[n0 + i], stile)

    # single vectorized store (one vst stream instead of 3 partial ones)
    imgtp_ref[...] = (tgt - mean) * inv_std + stile * noise_ref[...]


def preprocess(img_flat, noise, scale):
    """img_flat, noise: (N, 3, H, W) f32;  scale: (N,) f32."""
    N, C, H, W = img_flat.shape
    nb = _pick_sample_tile(N, per_sample_bytes=4 * C * H * W * 4)
    blk = pl.BlockSpec((nb, C, H, W), lambda n, s: (n, 0, 0, 0))
    grid_spec = pltpu.PrefetchScalarGridSpec(
        num_scalar_prefetch=1,
        grid=(N // nb,),
        in_specs=[blk, blk],
        out_specs=[blk, blk],
    )
    return pl.pallas_call(
        _preprocess_kernel,
        out_shape=(
            jax.ShapeDtypeStruct((N, C, H, W), jnp.float32),
            jax.ShapeDtypeStruct((N, C, H, W), jnp.float32),
        ),
        grid_spec=grid_spec,
        compiler_params=pltpu.CompilerParams(dimension_semantics=("parallel",)),
    )(scale, img_flat, noise)


# =============================================================================
# Kernel 2: fused loss reductions (row-tiled, parallel grid, partial outputs)
# =============================================================================
def _loss_kernel(fv0_ref, fvl_ref, tg0_ref, tgl_ref, o1_ref, out_ref):
    B = fv0_ref.shape[0]

    def pair_partial(fv_ref, tg_ref):
        # Exact per-pixel expansion of the (B, B) cross-broadcast:
        #   sum_ij (fv_j - tg_i)^2 = B*S(fv^2) + B*S(tg^2) - 2*S(fv)*S(tg)
        # (S = sum over batch).  Kills the B^2 loop; pure VPU work + one
        # vector reduce per tile.
        fv = fv_ref[...]
        tg = tg_ref[...]
        a1 = jnp.sum(fv, axis=0)          # (3, th, W)
        a2 = jnp.sum(fv * fv, axis=0)
        b1 = jnp.sum(tg, axis=0)
        b2 = jnp.sum(tg * tg, axis=0)
        contrib = jnp.float32(B) * (a2 + b2) - 2.0 * (a1 * b1)
        return jnp.sum(contrib)

    s0 = pair_partial(fv0_ref, tg0_ref)   # first-view term (row tile)
    sl = pair_partial(fvl_ref, tgl_ref)   # last-view term (row tile)

    # opacity: low-res block is resident (constant index_map); only the g==0
    # contribution is kept so the host-side sum over grid rows stays a plain sum.
    so = jnp.where(pl.program_id(0) == 0, jnp.sum(o1_ref[...]), 0.0)

    # lane-dense (1, 8, 128) partial-sum tile: lane0=s0, lane1=sl, lane2=so
    lane = jax.lax.broadcasted_iota(jnp.int32, out_ref.shape, len(out_ref.shape) - 1)
    tile = jnp.where(lane == 0, s0, 0.0)
    tile = jnp.where(lane == 1, sl, tile)
    tile = jnp.where(lane == 2, so, tile)
    out_ref[...] = tile


def loss_reduction(fv0, fvl, tg0, tgl, o1_lr_flat):
    """fv0, fvl, tg0, tgl: (B, 3, H, W);  o1_lr_flat: (B*Q, H/2, W/2)."""
    B, C, H, W = fv0.shape
    BQ, Hh, Wh = o1_lr_flat.shape

    # Row tile sized so 4 double-buffered input blocks stay well inside the
    # smallest (v7x, 64 MiB) VMEM while still giving a multi-step pipeline.
    th = _pick_row_tile(H, per_row_bytes=4 * B * C * W * 4)
    G = H // th

    img_blk = pl.BlockSpec((B, C, th, W), lambda g: (0, 0, g, 0))
    o1_blk = pl.BlockSpec((BQ, Hh, Wh), lambda g: (0, 0, 0))     # resident
    out_blk = pl.BlockSpec((1, 8, 128), lambda g: (g, 0, 0))

    partials = pl.pallas_call(
        _loss_kernel,
        out_shape=jax.ShapeDtypeStruct((G, 8, 128), jnp.float32),
        grid=(G,),
        in_specs=[img_blk, img_blk, img_blk, img_blk, o1_blk],
        out_specs=out_blk,
        compiler_params=pltpu.CompilerParams(dimension_semantics=("parallel",)),
    )(fv0, fvl, tg0, tgl, o1_lr_flat)

    # tiny follow-up combine (G rows, 3 scalars) — negligible glue
    s0 = jnp.sum(partials[:, 0, 0])
    sl = jnp.sum(partials[:, 0, 1])
    so = jnp.sum(partials[:, 0, 2])

    denom_rgb = jnp.float32(B * B * C * H * W)
    loss_rgb = (LAMBDA_RGB_FIRST * s0 + LAMBDA_RGB_OTHER * sl) / denom_rgb
    # mean over the broadcast (B,Q,3,H,W) o1 == mean over low-res o1
    loss_opacity = LAMBDA_OPACITY * so / jnp.float32(BQ * Hh * Wh)
    return loss_rgb, loss_opacity


# =============================================================================
# NerfDiff.forward (everything reproducible from the given source)
# =============================================================================
def _up2_nearest(x):
    """F.interpolate(scale_factor=2), default nearest mode."""
    x = jnp.repeat(x, 2, axis=-2)
    return jnp.repeat(x, 2, axis=-1)


@jax.jit
def nerf_diff_forward(imgs, first_view_lr, d1_lr, o1_lr, key):
    """
    imgs:          (B, V, 3, H, W), values in [-1, 1]   (data['imgs'])
    first_view_lr: (B, Q, C_fv, H//2, W//2)  rendered features (RGB = first 3 ch)
    d1_lr, o1_lr:  (B, Q, 1, H//2, W//2)     rendered depth / opacity
    """
    B, V, C, H, W = imgs.shape
    N = B * V
    img_flat = imgs.reshape(N, C, H, W)

    # per-sample scale: (torch.rand > 0.5) * torch.rand  (two independent draws)
    k1, k2, k3 = jax.random.split(key, 3)
    r1 = jax.random.uniform(k1, (N,), jnp.float32)
    r2 = jax.random.uniform(k2, (N,), jnp.float32)
    scale = (r1 > 0.5).astype(jnp.float32) * r2
    noise = jax.random.normal(k3, (N, C, H, W), jnp.float32)

    targets_flat, img_tp = preprocess(img_flat, noise, scale)
    targets = targets_flat.reshape(B, V, C, H, W)

    # torch.flip(img_tp, [2]) : vertical flip before the input UNet.
    unet_in = jnp.flip(img_tp, axis=2)
    # TODO(synk): DynamicUnet(resnet34) `input_unet`, NeRFNetwork and
    # render_multi_view are external modules with no source provided; the
    # rendered `first_view`, `d1`, `o1` are therefore taken as inputs.
    del unet_in

    Q = first_view_lr.shape[1]
    # train_diffusion_resolution == 128 branch.  Only views {0, -1} and the
    # 3 RGB channels enter the loss, so slice BEFORE the 2x nearest upsample
    # (avoids inflating Q*C_fv/(2*3) ~ 5x more data than needed).
    fv0 = _up2_nearest(first_view_lr[:, 0, :3])    # (B, 3, H, W)
    fvl = _up2_nearest(first_view_lr[:, -1, :3])   # (B, 3, H, W)
    # TODO(synk): optionally fuse this upsample into the loss kernel (read fv
    # at quarter resolution with 2x2-pooled target statistics) to save ~half
    # of the loss-kernel HBM bytes.
    del d1_lr  # d1 never enters any loss term

    # o1: the mean is invariant under nearest 2x upsample + 3-channel expand,
    # so feed the low-res opacity directly (drops a 12x-inflated HBM stream).
    o1_flat = o1_lr.reshape(B * Q, o1_lr.shape[-2], o1_lr.shape[-1])

    loss_rgb, loss_opacity = loss_reduction(
        fv0, fvl, targets[:, 0], targets[:, -1], o1_flat)

    # TODO(synk): KarrasDiffAugmentationPipeline and KPipeline.train_step
    # (denoising-UNet diffusion loss) are external/undefined; treated as 0.
    loss_train_diffusion = jnp.float32(0.0)

    loss = loss_train_diffusion + loss_rgb + loss_opacity
    return loss, {"rgb": loss_rgb, "opacity": loss_opacity,
                  "diffusion": loss_train_diffusion}


# =============================================================================
def _reference_losses(imgs, first_view_lr, o1_lr):
    """Pure-jnp reference of the loss math (noise term does not enter losses)."""
    B, V, C, H, W = imgs.shape
    Q = first_view_lr.shape[1]
    targets = 0.5 * (imgs + 1.0)
    fv_rgb = _up2_nearest(first_view_lr)[:, :, :3]
    o1 = jnp.broadcast_to(_up2_nearest(o1_lr), (B, Q, 3, H, W))
    loss_rgb = (LAMBDA_RGB_FIRST * jnp.mean((fv_rgb[:, 0] - targets[:, 0:1]) ** 2)
                + LAMBDA_RGB_OTHER * jnp.mean((fv_rgb[:, -1] - targets[:, -1:]) ** 2))
    loss_opacity = LAMBDA_OPACITY * jnp.mean(o1)
    return loss_rgb, loss_opacity


if __name__ == "__main__":
    B, V, C, H, W = 2, 2, 3, 16, 16
    Q = 2          # number of rendered views (as in forward)
    C_FV = 16      # rendered feature channels (first 3 = RGB), color_feat_dim

    key = jax.random.PRNGKey(0)
    k_img, k_fv, k_d, k_o, k_noise = jax.random.split(key, 5)

    imgs = jax.random.uniform(k_img, (B, V, C, H, W), jnp.float32, -1.0, 1.0)
    # TODO(synk): deterministic stand-ins for render_multi_view outputs
    # (NeRF renderer is not defined in the provided source).
    first_view_lr = jax.random.uniform(k_fv, (B, Q, C_FV, H // 2, W // 2), jnp.float32)
    d1_lr = jax.random.uniform(k_d, (B, Q, 1, H // 2, W // 2), jnp.float32)
    o1_lr = jax.random.uniform(k_o, (B, Q, 1, H // 2, W // 2), jnp.float32)

    loss, details = nerf_diff_forward(imgs, first_view_lr, d1_lr, o1_lr, k_noise)
    loss = jax.block_until_ready(loss)

    ref_rgb, ref_opa = _reference_losses(imgs, first_view_lr, o1_lr)
    assert jnp.allclose(details["rgb"], ref_rgb, rtol=1e-4, atol=1e-5), (
        details["rgb"], ref_rgb)
    assert jnp.allclose(details["opacity"], ref_opa, rtol=1e-4, atol=1e-5), (
        details["opacity"], ref_opa)
    assert jnp.allclose(loss, ref_rgb + ref_opa, rtol=1e-4, atol=1e-5)

    print("KERNEL_OK")
</pallas_src>

<mosaic_0001>
module attributes {stable_mosaic.version = 11 : i64} {
  func.func @_preprocess_kernel(%arg0: i32, %arg1: memref<4xf32, #tpu.memory_space<smem>>, %arg2: memref<2x3x16x16xf32, #tpu.memory_space<vmem>>, %arg3: memref<2x3x16x16xf32, #tpu.memory_space<vmem>>, %arg4: memref<2x3x16x16xf32, #tpu.memory_space<vmem>>, %arg5: memref<2x3x16x16xf32, #tpu.memory_space<vmem>>) attributes {dimension_semantics = [#tpu.dimension_semantics<parallel>], iteration_bounds = array<i64: 2>, scalar_prefetch = 1 : i64, scratch_operands = 0 : i64, tpu.core_type = #tpu.core_type<tc>, window_params = [{transform_indices = @transform_0, window_bounds = array<i64: 2, 3, 16, 16>}, {transform_indices = @transform_1, window_bounds = array<i64: 2, 3, 16, 16>}, {transform_indices = @transform_2, window_bounds = array<i64: 2, 3, 16, 16>}, {transform_indices = @transform_3, window_bounds = array<i64: 2, 3, 16, 16>}]} {
    %c2_i32 = arith.constant 2 : i32
    %0 = arith.muli %arg0, %c2_i32 : i32
    %c0 = arith.constant 0 : index
    %c0_0 = arith.constant 0 : index
    %c0_1 = arith.constant 0 : index
    %c0_2 = arith.constant 0 : index
    %1 = vector.load %arg2[%c0, %c0_0, %c0_1, %c0_2] : memref<2x3x16x16xf32, #tpu.memory_space<vmem>>, vector<2x3x16x16xf32>
    %cst = arith.constant 1.000000e+00 : f32
    %2 = vector.broadcast %cst : f32 to vector<2x3x16x16xf32>
    %3 = arith.addf %1, %2 : vector<2x3x16x16xf32>
    %cst_3 = arith.constant 5.000000e-01 : f32
    %4 = vector.broadcast %cst_3 : f32 to vector<2x3x16x16xf32>
    %5 = arith.mulf %4, %3 : vector<2x3x16x16xf32>
    %c0_4 = arith.constant 0 : index
    %c0_5 = arith.constant 0 : index
    %c0_6 = arith.constant 0 : index
    %c0_7 = arith.constant 0 : index
    %6 = vector.load %arg4[%c0_4, %c0_5, %c0_6, %c0_7] : memref<2x3x16x16xf32, #tpu.memory_space<vmem>>, vector<2x3x16x16xf32>
    tpu.vector_store %arg4[%c0_4, %c0_5, %c0_6, %c0_7], %5 {strides = array<i32>} : memref<2x3x16x16xf32, #tpu.memory_space<vmem>>, vector<2x3x16x16xf32>,
    %7 = tpu.iota {dimensions = array<i32: 1>} : vector<2x3x16x16xi32>
    %c0_i32 = arith.constant 0 : i32
    %8 = vector.broadcast %c0_i32 : i32 to vector<2x3x16x16xi32>
    %9 = arith.cmpi eq, %7, %8 : vector<2x3x16x16xi32>
    %c1_i32 = arith.constant 1 : i32
    %10 = vector.broadcast %c1_i32 : i32 to vector<2x3x16x16xi32>
    %11 = arith.cmpi eq, %7, %10 : vector<2x3x16x16xi32>
    %cst_8 = arith.constant 4.560000e-01 : f32
    %cst_9 = arith.constant 4.060000e-01 : f32
    %12 = vector.broadcast %cst_8 : f32 to vector<2x3x16x16xf32>
    %13 = vector.broadcast %cst_9 : f32 to vector<2x3x16x16xf32>
    %14 = arith.select %11, %12, %13 : vector<2x3x16x16xi1>, vector<2x3x16x16xf32>
    %cst_10 = arith.constant 4.850000e-01 : f32
    %15 = vector.broadcast %cst_10 : f32 to vector<2x3x16x16xf32>
    %16 = arith.select %9, %15, %14 : vector<2x3x16x16xi1>, vector<2x3x16x16xf32>
    %c0_i32_11 = arith.constant 0 : i32
    %17 = vector.broadcast %c0_i32_11 : i32 to vector<2x3x16x16xi32>
    %18 = arith.cmpi eq, %7, %17 : vector<2x3x16x16xi32>
    %c1_i32_12 = arith.constant 1 : i32
    %19 = vector.broadcast %c1_i32_12 : i32 to vector<2x3x16x16xi32>
    %20 = arith.cmpi eq, %7, %19 : vector<2x3x16x16xi32>
    %cst_13 = arith.constant 4.46428585 : f32
    %cst_14 = arith.constant 4.44444466 : f32
    %21 = vector.broadcast %cst_13 : f32 to vector<2x3x16x16xf32>
    %22 = vector.broadcast %cst_14 : f32 to vector<2x3x16x16xf32>
    %23 = arith.select %20, %21, %22 : vector<2x3x16x16xi1>, vector<2x3x16x16xf32>
    %cst_15 = arith.constant 4.36681223 : f32
    %24 = vector.broadcast %cst_15 : f32 to vector<2x3x16x16xf32>
    %25 = arith.select %18, %24, %23 : vector<2x3x16x16xi1>, vector<2x3x16x16xf32>
    %26 = tpu.iota {dimensions = array<i32: 0>} : vector<2x3x16x16xi32>
    %cst_16 = arith.constant 0.000000e+00 : f32
    %27 = vector.broadcast %cst_16 : f32 to vector<2x3x16x16xf32>
    %c0_i32_17 = arith.constant 0 : i32
    %28 = vector.broadcast %c0_i32_17 : i32 to vector<2x3x16x16xi32>
    %29 = arith.cmpi eq, %26, %28 : vector<2x3x16x16xi32>
    %c0_i32_18 = arith.constant 0 : i32
    %30 = arith.addi %0, %c0_i32_18 : i32
    %31 = arith.index_cast %30 : i32 to index
    %32 = memref.load %arg1[%31] : memref<4xf32, #tpu.memory_space<smem>>
    %33 = vector.broadcast %32 : f32 to vector<2x3x16x16xf32>
    %34 = arith.select %29, %33, %27 : vector<2x3x16x16xi1>, vector<2x3x16x16xf32>
    %c1_i32_19 = arith.constant 1 : i32
    %35 = vector.broadcast %c1_i32_19 : i32 to vector<2x3x16x16xi32>
    %36 = arith.cmpi eq, %26, %35 : vector<2x3x16x16xi32>
    %c1_i32_20 = arith.constant 1 : i32
    %37 = arith.addi %0, %c1_i32_20 : i32
    %38 = arith.index_cast %37 : i32 to index
    %39 = memref.load %arg1[%38] : memref<4xf32, #tpu.memory_space<smem>>
    %40 = vector.broadcast %39 : f32 to vector<2x3x16x16xf32>
    %41 = arith.select %36, %40, %34 : vector<2x3x16x16xi1>, vector<2x3x16x16xf32>
    %42 = arith.subf %5, %16 : vector<2x3x16x16xf32>
    %43 = arith.mulf %42, %25 : vector<2x3x16x16xf32>
    %c0_21 = arith.constant 0 : index
    %c0_22 = arith.constant 0 : index
    %c0_23 = arith.constant 0 : index
    %c0_24 = arith.constant 0 : index
    %44 = vector.load %arg3[%c0_21, %c0_22, %c0_23, %c0_24] : memref<2x3x16x16xf32, #tpu.memory_space<vmem>>, vector<2x3x16x16xf32>
    %45 = arith.mulf %41, %44 : vector<2x3x16x16xf32>
    %46 = arith.addf %43, %45 : vector<2x3x16x16xf32>
    %c0_25 = arith.constant 0 : index
    %c0_26 = arith.constant 0 : index
    %c0_27 = arith.constant 0 : index
    %c0_28 = arith.constant 0 : index
    %47 = vector.load %arg5[%c0_25, %c0_26, %c0_27, %c0_28] : memref<2x3x16x16xf32, #tpu.memory_space<vmem>>, vector<2x3x16x16xf32>
    tpu.vector_store %arg5[%c0_25, %c0_26, %c0_27, %c0_28], %46 {strides = array<i32>} : memref<2x3x16x16xf32, #tpu.memory_space<vmem>>, vector<2x3x16x16xf32>,
    return
  }
  func.func @transform_0(%arg0: i32, %arg1: memref<4xf32, #tpu.memory_space<smem>>) -> (i32, i32, i32, i32) {
    %c0_i32 = arith.constant 0 : i32
    %c0_i32_0 = arith.constant 0 : i32
    %c0_i32_1 = arith.constant 0 : i32
    %c0_i32_2 = arith.constant 0 : i32
    return %arg0, %c0_i32, %c0_i32_0, %c0_i32_1 : i32, i32, i32, i32
  }
  func.func @transform_1(%arg0: i32, %arg1: memref<4xf32, #tpu.memory_space<smem>>) -> (i32, i32, i32, i32) {
    %c0_i32 = arith.constant 0 : i32
    %c0_i32_0 = arith.constant 0 : i32
    %c0_i32_1 = arith.constant 0 : i32
    %c0_i32_2 = arith.constant 0 : i32
    return %arg0, %c0_i32, %c0_i32_0, %c0_i32_1 : i32, i32, i32, i32
  }
  func.func @transform_2(%arg0: i32, %arg1: memref<4xf32, #tpu.memory_space<smem>>) -> (i32, i32, i32, i32) {
    %c0_i32 = arith.constant 0 : i32
    %c0_i32_0 = arith.constant 0 : i32
    %c0_i32_1 = arith.constant 0 : i32
    %c0_i32_2 = arith.constant 0 : i32
    return %arg0, %c0_i32, %c0_i32_0, %c0_i32_1 : i32, i32, i32, i32
  }
  func.func @transform_3(%arg0: i32, %arg1: memref<4xf32, #tpu.memory_space<smem>>) -> (i32, i32, i32, i32) {
    %c0_i32 = arith.constant 0 : i32
    %c0_i32_0 = arith.constant 0 : i32
    %c0_i32_1 = arith.constant 0 : i32
    %c0_i32_2 = arith.constant 0 : i32
    return %arg0, %c0_i32, %c0_i32_0, %c0_i32_1 : i32, i32, i32, i32
  }
}

module attributes {stable_mosaic.version = 11 : i64} {
  func.func @_loss_kernel(%arg0: i32, %arg1: memref<2x3x8x16xf32, #tpu.memory_space<vmem>>, %arg2: memref<2x3x8x16xf32, #tpu.memory_space<vmem>>, %arg3: memref<2x3x8x16xf32, #tpu.memory_space<vmem>>, %arg4: memref<2x3x8x16xf32, #tpu.memory_space<vmem>>, %arg5: memref<4x8x8xf32, #tpu.memory_space<vmem>>, %arg6: memref<1x8x128xf32, #tpu.memory_space<vmem>>) attributes {dimension_semantics = [#tpu.dimension_semantics<parallel>], iteration_bounds = array<i64: 2>, scalar_prefetch = 0 : i64, scratch_operands = 0 : i64, tpu.core_type = #tpu.core_type<tc>, window_params = [{transform_indices = @transform_0, window_bounds = array<i64: 2, 3, 8, 16>}, {transform_indices = @transform_1, window_bounds = array<i64: 2, 3, 8, 16>}, {transform_indices = @transform_2, window_bounds = array<i64: 2, 3, 8, 16>}, {transform_indices = @transform_3, window_bounds = array<i64: 2, 3, 8, 16>}, {pipeline_mode = #tpu.pipeline_mode<synchronous>, transform_indices = @transform_4, window_bounds = array<i64: 4, 8, 8>}, {transform_indices = @transform_5, window_bounds = array<i64: 1, 8, 128>}]} {
    %c0 = arith.constant 0 : index
    %c0_0 = arith.constant 0 : index
    %c0_1 = arith.constant 0 : index
    %c0_2 = arith.constant 0 : index
    %0 = vector.load %arg1[%c0, %c0_0, %c0_1, %c0_2] : memref<2x3x8x16xf32, #tpu.memory_space<vmem>>, vector<2x3x8x16xf32>
    %c0_3 = arith.constant 0 : index
    %c0_4 = arith.constant 0 : index
    %c0_5 = arith.constant 0 : index
    %c0_6 = arith.constant 0 : index
    %1 = vector.load %arg3[%c0_3, %c0_4, %c0_5, %c0_6] : memref<2x3x8x16xf32, #tpu.memory_space<vmem>>, vector<2x3x8x16xf32>
    %cst = arith.constant dense<0.000000e+00> : vector<3x8x16xf32>
    %2 = vector.multi_reduction <add>, %0, %cst [0] : vector<2x3x8x16xf32> to vector<3x8x16xf32>
    %3 = arith.mulf %0, %0 : vector<2x3x8x16xf32>
    %cst_7 = arith.constant dense<0.000000e+00> : vector<3x8x16xf32>
    %4 = vector.multi_reduction <add>, %3, %cst_7 [0] : vector<2x3x8x16xf32> to vector<3x8x16xf32>
    %cst_8 = arith.constant dense<0.000000e+00> : vector<3x8x16xf32>
    %5 = vector.multi_reduction <add>, %1, %cst_8 [0] : vector<2x3x8x16xf32> to vector<3x8x16xf32>
    %6 = arith.mulf %1, %1 : vector<2x3x8x16xf32>
    %cst_9 = arith.constant dense<0.000000e+00> : vector<3x8x16xf32>
    %7 = vector.multi_reduction <add>, %6, %cst_9 [0] : vector<2x3x8x16xf32> to vector<3x8x16xf32>
    %8 = arith.addf %4, %7 : vector<3x8x16xf32>
    %cst_10 = arith.constant 2.000000e+00 : f32
    %9 = vector.broadcast %cst_10 : f32 to vector<3x8x16xf32>
    %10 = arith.mulf %9, %8 : vector<3x8x16xf32>
    %11 = arith.mulf %2, %5 : vector<3x8x16xf32>
    %cst_11 = arith.constant 2.000000e+00 : f32
    %12 = vector.broadcast %cst_11 : f32 to vector<3x8x16xf32>
    %13 = arith.mulf %12, %11 : vector<3x8x16xf32>
    %14 = arith.subf %10, %13 : vector<3x8x16xf32>
    %15 = vector.shape_cast %14 : vector<3x8x16xf32> to vector<1x3x8x16xf32>
    %cst_12 = arith.constant dense<0.000000e+00> : vector<1xf32>
    %16 = vector.multi_reduction <add>, %15, %cst_12 [1, 2, 3] : vector<1x3x8x16xf32> to vector<1xf32>
    %17 = vector.shape_cast %16 : vector<1xf32> to vector<1x1x1x1xf32>
    %18 = vector.extract %17[0, 0, 0, 0] : f32 from vector<1x1x1x1xf32>
    %c0_13 = arith.constant 0 : index
    %c0_14 = arith.constant 0 : index
    %c0_15 = arith.constant 0 : index
    %c0_16 = arith.constant 0 : index
    %19 = vector.load %arg2[%c0_13, %c0_14, %c0_15, %c0_16] : memref<2x3x8x16xf32, #tpu.memory_space<vmem>>, vector<2x3x8x16xf32>
    %c0_17 = arith.constant 0 : index
    %c0_18 = arith.constant 0 : index
    %c0_19 = arith.constant 0 : index
    %c0_20 = arith.constant 0 : index
    %20 = vector.load %arg4[%c0_17, %c0_18, %c0_19, %c0_20] : memref<2x3x8x16xf32, #tpu.memory_space<vmem>>, vector<2x3x8x16xf32>
    %cst_21 = arith.constant dense<0.000000e+00> : vector<3x8x16xf32>
    %21 = vector.multi_reduction <add>, %19, %cst_21 [0] : vector<2x3x8x16xf32> to vector<3x8x16xf32>
    %22 = arith.mulf %19, %19 : vector<2x3x8x16xf32>
    %cst_22 = arith.constant dense<0.000000e+00> : vector<3x8x16xf32>
    %23 = vector.multi_reduction <add>, %22, %cst_22 [0] : vector<2x3x8x16xf32> to vector<3x8x16xf32>
    %cst_23 = arith.constant dense<0.000000e+00> : vector<3x8x16xf32>
    %24 = vector.multi_reduction <add>, %20, %cst_23 [0] : vector<2x3x8x16xf32> to vector<3x8x16xf32>
    %25 = arith.mulf %20, %20 : vector<2x3x8x16xf32>
    %cst_24 = arith.constant dense<0.000000e+00> : vector<3x8x16xf32>
    %26 = vector.multi_reduction <add>, %25, %cst_24 [0] : vector<2x3x8x16xf32> to vector<3x8x16xf32>
    %27 = arith.addf %23, %26 : vector<3x8x16xf32>
    %cst_25 = arith.constant 2.000000e+00 : f32
    %28 = vector.broadcast %cst_25 : f32 to vector<3x8x16xf32>
    %29 = arith.mulf %28, %27 : vector<3x8x16xf32>
    %30 = arith.mulf %21, %24 : vector<3x8x16xf32>
    %cst_26 = arith.constant 2.000000e+00 : f32
    %31 = vector.broadcast %cst_26 : f32 to vector<3x8x16xf32>
    %32 = arith.mulf %31, %30 : vector<3x8x16xf32>
    %33 = arith.subf %29, %32 : vector<3x8x16xf32>
    %34 = vector.shape_cast %33 : vector<3x8x16xf32> to vector<1x3x8x16xf32>
    %cst_27 = arith.constant dense<0.000000e+00> : vector<1xf32>
    %35 = vector.multi_reduction <add>, %34, %cst_27 [1, 2, 3] : vector<1x3x8x16xf32> to vector<1xf32>
    %36 = vector.shape_cast %35 : vector<1xf32> to vector<1x1x1x1xf32>
    %37 = vector.extract %36[0, 0, 0, 0] : f32 from vector<1x1x1x1xf32>
    %c0_i32 = arith.constant 0 : i32
    %38 = arith.cmpi eq, %arg0, %c0_i32 : i32
    %c0_28 = arith.constant 0 : index
    %c0_29 = arith.constant 0 : index
    %c0_30 = arith.constant 0 : index
    %39 = vector.load %arg5[%c0_28, %c0_29, %c0_30] : memref<4x8x8xf32, #tpu.memory_space<vmem>>, vector<4x8x8xf32>
    %40 = vector.shape_cast %39 : vector<4x8x8xf32> to vector<1x4x8x8xf32>
    %cst_31 = arith.constant dense<0.000000e+00> : vector<1xf32>
    %41 = vector.multi_reduction <add>, %40, %cst_31 [1, 2, 3] : vector<1x4x8x8xf32> to vector<1xf32>
    %42 = vector.shape_cast %41 : vector<1xf32> to vector<1x1x1x1xf32>
    %43 = vector.extract %42[0, 0, 0, 0] : f32 from vector<1x1x1x1xf32>
    %cst_32 = arith.constant 0.000000e+00 : f32
    %44 = arith.select %38, %43, %cst_32 : f32
    %45 = tpu.iota {dimensions = array<i32: 2>} : vector<1x8x128xi32>
    %c0_i32_33 = arith.constant 0 : i32
    %46 = vector.broadcast %c0_i32_33 : i32 to vector<1x8x128xi32>
    %47 = arith.cmpi eq, %45, %46 : vector<1x8x128xi32>
    %cst_34 = arith.constant 0.000000e+00 : f32
    %48 = vector.broadcast %18 : f32 to vector<1x8x128xf32>
    %49 = vector.broadcast %cst_34 : f32 to vector<1x8x128xf32>
    %50 = arith.select %47, %48, %49 : vector<1x8x128xi1>, vector<1x8x128xf32>
    %c1_i32 = arith.constant 1 : i32
    %51 = vector.broadcast %c1_i32 : i32 to vector<1x8x128xi32>
    %52 = arith.cmpi eq, %45, %51 : vector<1x8x128xi32>
    %53 = vector.broadcast %37 : f32 to vector<1x8x128xf32>
    %54 = arith.select %52, %53, %50 : vector<1x8x128xi1>, vector<1x8x128xf32>
    %c2_i32 = arith.constant 2 : i32
    %55 = vector.broadcast %c2_i32 : i32 to vector<1x8x128xi32>
    %56 = arith.cmpi eq, %45, %55 : vector<1x8x128xi32>
    %57 = vector.broadcast %44 : f32 to vector<1x8x128xf32>
    %58 = arith.select %56, %57, %54 : vector<1x8x128xi1>, vector<1x8x128xf32>
    %c0_35 = arith.constant 0 : index
    %c0_36 = arith.constant 0 : index
    %c0_37 = arith.constant 0 : index
    %59 = vector.load %arg6[%c0_35, %c0_36, %c0_37] : memref<1x8x128xf32, #tpu.memory_space<vmem>>, vector<1x8x128xf32>
    tpu.vector_store %arg6[%c0_35, %c0_36, %c0_37], %58 {strides = array<i32>} : memref<1x8x128xf32, #tpu.memory_space<vmem>>, vector<1x8x128xf32>,
    return
  }
  func.func @transform_0(%arg0: i32) -> (i32, i32, i32, i32) {
    %c0_i32 = arith.constant 0 : i32
    %c0_i32_0 = arith.constant 0 : i32
    %c0_i32_1 = arith.constant 0 : i32
    %c0_i32_2 = arith.constant 0 : i32
    return %c0_i32, %c0_i32_0, %arg0, %c0_i32_1 : i32, i32, i32, i32
  }
  func.func @transform_1(%arg0: i32) -> (i32, i32, i32, i32) {
    %c0_i32 = arith.constant 0 : i32
    %c0_i32_0 = arith.constant 0 : i32
    %c0_i32_1 = arith.constant 0 : i32
    %c0_i32_2 = arith.constant 0 : i32
    return %c0_i32, %c0_i32_0, %arg0, %c0_i32_1 : i32, i32, i32, i32
  }
  func.func @transform_2(%arg0: i32) -> (i32, i32, i32, i32) {
    %c0_i32 = arith.constant 0 : i32
    %c0_i32_0 = arith.constant 0 : i32
    %c0_i32_1 = arith.constant 0 : i32
    %c0_i32_2 = arith.constant 0 : i32
    return %c0_i32, %c0_i32_0, %arg0, %c0_i32_1 : i32, i32, i32, i32
  }
  func.func @transform_3(%arg0: i32) -> (i32, i32, i32, i32) {
    %c0_i32 = arith.constant 0 : i32
    %c0_i32_0 = arith.constant 0 : i32
    %c0_i32_1 = arith.constant 0 : i32
    %c0_i32_2 = arith.constant 0 : i32
    return %c0_i32, %c0_i32_0, %arg0, %c0_i32_1 : i32, i32, i32, i32
  }
  func.func @transform_4(%arg0: i32) -> (i32, i32, i32) {
    %c0_i32 = arith.constant 0 : i32
    %c0_i32_0 = arith.constant 0 : i32
    %c0_i32_1 = arith.constant 0 : i32
    %c0_i32_2 = arith.constant 0 : i32
    return %c0_i32, %c0_i32_0, %c0_i32_1 : i32, i32, i32
  }
  func.func @transform_5(%arg0: i32) -> (i32, i32, i32) {
    %c0_i32 = arith.constant 0 : i32
    %c0_i32_0 = arith.constant 0 : i32
    %c0_i32_1 = arith.constant 0 : i32
    return %arg0, %c0_i32, %c0_i32_0 : i32, i32, i32
  }
}

</mosaic_0001>

<bundles_post_ra>
// kernel: nerf_diff_forward.4
= control target key start
LH: loop header
LB: loop body
LE: loop exit
PB: predicated region body
PF: predicated region fallthrough
CT: control target
= control target key end

     0   :  { %s857_s0 = inlined_call_operand.vmem [shape: f32[4], index: 0, kind: input, shape index: {}]   ;;  %s858_s1 = inlined_call_operand.vmem [shape: f32[4,3,16,16], index: 1, kind: input, shape index: {}]   ;;  %s859_s2 = inlined_call_operand.vmem [shape: f32[4,3,16,16], index: 2, kind: input, shape index: {}]   ;;  %s860_s3 = inlined_call_operand.vmem [shape: f32[4,3,16,16], index: 3, kind: output, shape index: {0}]   ;;  %s861_s4 = inlined_call_operand.hbm [shape: f32[4,3,16,16], index: 4, kind: output, shape index: {1}]  }
   0x1   :  { %s10_s17 = sshll.u32 %s857_s0, 4  ;;  %s11_s17 = int_to_ptr.vmem [resolvable:$true] %s10_s17 }
   0x2   :  { %s548_s18 = scalar_lea.vmem %s11_s17, 16  ;;  %p553_p1 = scmp.lt.s32.totalorder %s11_s17, %s11_s17 }
   0x3   :  { %p549_p0 = scmp.ne.s32.totalorder %s11_s17, %s548_s18  ;;  %p554_p2 = scmp.lt.s32.totalorder %s548_s18, %s548_s18 }
   0x5   :  { %p555_p3 = por %p554_p2, %p553_p1 }
   0x7   :  { %p556_p4 = pnand %p555_p3, %p549_p0 }
   0x9   :  { %559 = shalt.err (!%p556_p4)  }
   0xa   :  { %s626_s19 = smov [#allocation3]  }
   0xb   :  { %13 = dma.vmem_to_smem %s11_s17, 16, %s626_s19, [#allocation2] }
   0xc   :  { %604 = dma.done.wait [#allocation2], 16 }
   0xd   :  { %605 = vsyncadd [#allocation2], 4294967280 }
   0xe   :  { %15 = sfence }
   0xf   :  { %16 = vsyncpa [#allocation5], 0 }
  0x10   :  { %18 = vsyncpa [#allocation5 + $0x1], 0  ;;  %s658_s20 = smov 0   ;;  %s660_s21 = smov 0  }
  0x11   :  { %s662_s0 = smov 0   ;;  %s664_s22 = smov 0  }
  0x12 LB: > { %s679_s23 = sadd.s32 4294967295, %s624_s22   ;;  %s475_s24 = sadd.s32 4294967294, %s624_s22   ;;  %s624_s22 = sphi %s664_s22, %s867_s22   ;;  %s620_s0 = sphi %s662_s0, %s866_s0   ;;  %s616_s21 = sphi %s660_s21, %s865_s21   ;;  %s612_s20 = sphi %s658_s20, %s864_s20  }
  0x13   : > { %s683_s25 = sadd.s32 1, %s624_s22   ;;  %s109_s26 = sadd.s32 1, %s620_s0 }
  0x14   : > { %s106_s27 = ssub.s32 %s624_s22, %s683_s25  ;;  %p119_p5 = scmp.ne.s32.totalorder %s620_s0, %s616_s21 }
  0x15   : > { %p107_p6 = scmp.eq.s32.totalorder %s106_s27, 0  ;;  %p120_p7 = scmp.eq.s32.totalorder %s679_s23, 1 }
  0x16   : > { %p125_p8 = scmp.ne.s32.totalorder %s616_s21, %s612_s20  ;;  %p126_p9 = scmp.eq.s32.totalorder %s475_s24, 1 }
  0x17   : > { %s694_s28 = scalar_select %p107_p6, %s620_s0, %s109_s26  }
  0x18   : > { %p696_p10 = por %p120_p7, %p119_p5  ;;  %p700_p11 = por %p126_p9, %p125_p8 }
  0x19   : > { %p478_p12 = scmp.ge.s32.totalorder %s624_s22, 1  ;;  %p164_p13 = scmp.lt.s32.totalorder %s624_s22, 3 }
  0x1b   : > { %p165_p0 = pnand %p478_p12, %p164_p13 }
  0x1c   : > { %s479_s5 = sshll.u32 (!%p165_p0), %s679_s23, 1  ;;  %s198_s8 = sand.u32 (!%p165_p0), 1, %s616_s21   ;;  %vm260_vm0 = vcmask (!%p165_p0), 130048  }
  0x1d   : > { %168 = sbr.rel (%p165_p0) target bundleno = 81 (0x51), region = 28  ;;  %p202_p1 = scmp.lt.s32.totalorder (!%p165_p0), %s479_s5, 3 }
  0x1e   : > { %s273_s6 = sld [smem:[#allocation3 + %s479_s5]] (!%p165_p0)  ;;  %s275_s10 = sadd.s32 (!%p165_p0), 1, %s479_s5 }
  0x1f   : > { %s715_s14 = smul.u32 (!%p165_p0), 96, %s198_s8  ;;  %s725_s18 = sld [smem:[#allocation3 + %s275_s10]] (!%p165_p0) }
  0x20   : > { %s816_s10 = scalar_lea.sflag (!%p165_p0), [#allocation5], %s198_s8  ;;  %s627_s12 = smov (!%p165_p0), [#allocation4]  }
  0x21   : > { %s761_s27 = scalar_lea.vmem (!%p165_p0), [#allocation4], %s715_s14 }
  0x24   : > { %s203_s7 = scalar_select %p202_p1, %s479_s5, 3  ;;  %v274_v3 = vstv %s273_s6 }
  0x25   : > { %v277_v53 = vstv %s725_s18  ;;  %s505_s5 = smul.u32 1536, %s679_s23  ;;  %s375_s6 = sshll.u32 %s761_s27, 4  ;;  %s804_s6 = int_to_ptr.vmem [resolvable:$true] %s375_s6 }
  0x26   : > { %s504_s9 = smul.u32 48, %s203_s7  ;;  %s560_s11 = scalar_lea.vmem %s804_s6, 1536 }
  0x27   : > { %p561_p2 = scmp.ne.s32.totalorder %s804_s6, %s560_s11 }
  0x28   : > { %s711_s13 = scalar_lea.vmem %s858_s1, %s504_s9  ;;  %s723_s17 = scalar_lea.vmem %s859_s2, %s504_s9 }
  0x29   : > { %v224_v0 = vld [vmem:[%s711_s13] sm:$0xff]  ;;  %v225_v1 = vld [vmem:[%s711_s13 + $0x8] sm:$0xff]  ;;  %v226_v2 = vld [vmem:[%s711_s13 + $0x10] sm:$0xff]  ;;  %s733_s26 = scalar_lea.vmem %s860_s3, %s504_s9  ;;  %s802_s9 = scalar_lea.hbm %s861_s4, %s505_s5 }
  0x2a   : > { %v236_v4 = vadd.f32 1.0, %v224_v0  ;;  %v237_v5 = vadd.f32 1.0, %v225_v1  ;;  %v238_v6 = vadd.f32 1.0, %v226_v2  ;;  %v227_v7 = vld [vmem:[%s711_s13 + $0x18] sm:$0xff]  ;;  %v228_v8 = vld [vmem:[%s711_s13 + $0x20] sm:$0xff]  ;;  %v229_v9 = vld [vmem:[%s711_s13 + $0x28] sm:$0xff]  ;;  %p562_p3 = pnand %p561_p2, %p696_p10 }
  0x2b   : > { %v239_v10 = vadd.f32 1.0, %v227_v7  ;;  %v240_v11 = vadd.f32 1.0, %v228_v8  ;;  %v241_v12 = vadd.f32 1.0, %v229_v9  ;;  %v302_v13 = vld [vmem:[%s723_s17] sm:$0xff]  ;;  %v303_v14 = vld [vmem:[%s723_s17 + $0x8] sm:$0xff]  ;;  %v304_v15 = vld [vmem:[%s723_s17 + $0x10] sm:$0xff] }
  0x2c   : > { %v248_v16 = vmul.f32 0.5, %v236_v4  ;;  %v249_v17 = vmul.f32 0.5, %v237_v5  ;;  %v250_v18 = vmul.f32 0.5, %v238_v6  ;;  %v314_v19 = vmul.f32 %v302_v13, %v274_v3  ;;  %v305_v20 = vld [vmem:[%s723_s17 + $0x18] sm:$0xff]  ;;  %v306_v25 = vld [vmem:[%s723_s17 + $0x20] sm:$0xff]  ;;  %v307_v26 = vld [vmem:[%s723_s17 + $0x28] sm:$0xff]  ;;  %p563_p4 = pneg %p562_p3 }
  0x2d   : > { %v251_v21 = vmul.f32 0.5, %v239_v10  ;;  %v252_v22 = vmul.f32 0.5, %v240_v11  ;;  %v253_v23 = vmul.f32 0.5, %v241_v12  ;;  %v315_v24 = vmul.f32 %v303_v14, %v274_v3  ;;  %v230_v27 = vld [vmem:[%s711_s13 + $0x30] sm:$0xff]  ;;  %v231_v36 = vld [vmem:[%s711_s13 + $0x38] sm:$0xff]  ;;  %v232_v49 = vld [vmem:[%s711_s13 + $0x40] sm:$0xff] }
  0x2e   : > { %261 = vst.msk [vmem:[%s733_s26] sm:$0xff] %vm260_vm0, %v248_v16  ;;  %v486_v28 = vadd.f32 -0.485, %v248_v16  ;;  %262 = vst.msk [vmem:[%s733_s26 + $0x8] sm:$0xff] %vm260_vm0, %v249_v17  ;;  %v487_v29 = vadd.f32 -0.485, %v249_v17  ;;  %v316_v31 = vmul.f32 %v304_v15, %v274_v3  ;;  %v317_v35 = vmul.f32 %v305_v20, %v274_v3 }
  0x2f   : > { %263 = vst.msk [vmem:[%s733_s26 + $0x10] sm:$0xff] %vm260_vm0, %v250_v18  ;;  %v488_v30 = vadd.f32 -0.456, %v250_v18  ;;  %264 = vst.msk [vmem:[%s733_s26 + $0x18] sm:$0xff] %vm260_vm0, %v251_v21  ;;  %v489_v32 = vadd.f32 -0.456, %v251_v21  ;;  %v318_v40 = vmul.f32 %v306_v25, %v274_v3  ;;  %v319_v44 = vmul.f32 %v307_v26, %v274_v3 }
  0x30   : > { %265 = vst.msk [vmem:[%s733_s26 + $0x20] sm:$0xff] %vm260_vm0, %v252_v22  ;;  %v490_v33 = vadd.f32 -0.406, %v252_v22  ;;  %266 = vst.msk [vmem:[%s733_s26 + $0x28] sm:$0xff] %vm260_vm0, %v253_v23  ;;  %v491_v34 = vadd.f32 -0.406, %v253_v23 }
  0x31   : > { %v290_v37 = vmul.f32 4.366812, %v486_v28  ;;  %v291_v38 = vmul.f32 4.366812, %v487_v29  ;;  %v292_v39 = vmul.f32 4.464286, %v488_v30 }
  0x32   : > { %v293_v41 = vmul.f32 4.464286, %v489_v32  ;;  %v294_v42 = vmul.f32 4.4444447, %v490_v33  ;;  %v295_v43 = vmul.f32 4.4444447, %v491_v34 }
  0x33   : > { %v326_v45 = vadd.f32 %v314_v19, %v290_v37  ;;  %v327_v46 = vadd.f32 %v315_v24, %v291_v38  ;;  %v328_v47 = vadd.f32 %v316_v31, %v292_v39  ;;  %v242_v48 = vadd.f32 1.0, %v230_v27  ;;  %v308_v54 = vld [vmem:[%s723_s17 + $0x30] sm:$0xff]  ;;  %v233_v55 = vld [vmem:[%s711_s13 + $0x48] sm:$0xff]  ;;  %v309_v59 = vld [vmem:[%s723_s17 + $0x38] sm:$0xff] }
  0x34   : > { %v329_v50 = vadd.f32 %v317_v35, %v293_v41  ;;  %v330_v51 = vadd.f32 %v318_v40, %v294_v42  ;;  %v331_v52 = vadd.f32 %v319_v44, %v295_v43  ;;  %v234_v56 = vld [vmem:[%s711_s13 + $0x50] sm:$0xff]  ;;  %v243_v58 = vadd.f32 1.0, %v231_v36  ;;  %v235_v60 = vld [vmem:[%s711_s13 + $0x58] sm:$0xff]  ;;  %v310_v62 = vld [vmem:[%s723_s17 + $0x40] sm:$0xff]  ;;  %s564_s13 = sshll.u32 %s627_s12, 4  ;;  %s565_s13 = int_to_ptr.vmem [resolvable:$false] %s564_s13 }
  0x35   : > { %338 = vst.msk [vmem:[%s761_s27] sm:$0xff] %vm260_vm0, %v326_v45  ;;  %339 = vst.msk [vmem:[%s761_s27 + $0x8] sm:$0xff] %vm260_vm0, %v327_v46  ;;  %v254_v57 = vmul.f32 0.5, %v242_v48  ;;  %v244_v61 = vadd.f32 1.0, %v232_v49  ;;  %v245_v63 = vadd.f32 1.0, %v233_v55  ;;  %v320_v1 = vmul.f32 %v308_v54, %v277_v53  ;;  %v311_v3 = vld [vmem:[%s723_s17 + $0x48] sm:$0xff]  ;;  %p567_p5 = scmp.lt.s32.totalorder %s804_s6, %s565_s13 }
  0x36   : > { %340 = vst.msk [vmem:[%s761_s27 + $0x10] sm:$0xff] %vm260_vm0, %v328_v47  ;;  %341 = vst.msk [vmem:[%s761_s27 + $0x18] sm:$0xff] %vm260_vm0, %v329_v50  ;;  %v255_v2 = vmul.f32 0.5, %v243_v58  ;;  %v246_v4 = vadd.f32 1.0, %v234_v56  ;;  %v321_v5 = vmul.f32 %v309_v59, %v277_v53  ;;  %v312_v8 = vld [vmem:[%s723_s17 + $0x50] sm:$0xff]  ;;  %v247_v9 = vadd.f32 1.0, %v235_v60 }
  0x37   : > { %342 = vst.msk [vmem:[%s761_s27 + $0x20] sm:$0xff] %vm260_vm0, %v330_v51  ;;  %343 = vst.msk [vmem:[%s761_s27 + $0x28] sm:$0xff] %vm260_vm0, %v331_v52  ;;  %v492_v0 = vadd.f32 -0.485, %v254_v57  ;;  %v256_v6 = vmul.f32 0.5, %v244_v61  ;;  %v257_v7 = vmul.f32 0.5, %v245_v63  ;;  %v322_v12 = vmul.f32 %v310_v62, %v277_v53 }
  0x38   : > { %267 = vst.msk [vmem:[%s733_s26 + $0x30] sm:$0xff] %vm260_vm0, %v254_v57  ;;  %v493_v11 = vadd.f32 -0.485, %v255_v2  ;;  %268 = vst.msk [vmem:[%s733_s26 + $0x38] sm:$0xff] %vm260_vm0, %v255_v2  ;;  %v258_v13 = vmul.f32 0.5, %v246_v4  ;;  %v313_v14 = vld [vmem:[%s723_s17 + $0x58] sm:$0xff]  ;;  %v323_v17 = vmul.f32 %v311_v3, %v277_v53  ;;  %v324_v22 = vmul.f32 %v312_v8, %v277_v53 }
  0x39   : > { %v296_v10 = vmul.f32 4.366812, %v492_v0  ;;  %v494_v15 = vadd.f32 -0.456, %v256_v6  ;;  %269 = vst.msk [vmem:[%s733_s26 + $0x40] sm:$0xff] %vm260_vm0, %v256_v6  ;;  %270 = vst.msk [vmem:[%s733_s26 + $0x48] sm:$0xff] %vm260_vm0, %v257_v7  ;;  %v325_v26 = vmul.f32 %v313_v14, %v277_v53 }
  0x3a   : > { %v495_v16 = vadd.f32 -0.456, %v257_v7  ;;  %v259_v18 = vmul.f32 0.5, %v247_v9  ;;  %v297_v20 = vmul.f32 4.366812, %v493_v11  ;;  %271 = vst.msk [vmem:[%s733_s26 + $0x50] sm:$0xff] %vm260_vm0, %v258_v13 }
  0x3b   : > { %v332_v19 = vadd.f32 %v320_v1, %v296_v10  ;;  %v496_v21 = vadd.f32 -0.406, %v258_v13  ;;  %v298_v23 = vmul.f32 4.464286, %v494_v15  ;;  %s566_s14 = scalar_lea.vmem %s565_s13, 3072 }
  0x3c   : > { %v299_v24 = vmul.f32 4.464286, %v495_v16  ;;  %v497_v25 = vadd.f32 -0.406, %v259_v18  ;;  %272 = vst.msk [vmem:[%s733_s26 + $0x58] sm:$0xff] %vm260_vm0, %v259_v18  ;;  %v333_v27 = vadd.f32 %v321_v5, %v297_v20  ;;  %p568_p6 = scmp.lt.s32.totalorder %s566_s14, %s560_s11 }
  0x3d   : > { %344 = vst.msk [vmem:[%s761_s27 + $0x30] sm:$0xff] %vm260_vm0, %v332_v19  ;;  %v300_v28 = vmul.f32 4.4444447, %v496_v21  ;;  %v334_v29 = vadd.f32 %v322_v12, %v298_v23 }
  0x3e   : > { %v335_v30 = vadd.f32 %v323_v17, %v299_v24  ;;  %v301_v31 = vmul.f32 4.4444447, %v497_v25  ;;  %345 = vst.msk [vmem:[%s761_s27 + $0x38] sm:$0xff] %vm260_vm0, %v333_v27  ;;  %p569_p7 = por %p568_p6, %p567_p5 }
  0x3f   : > { %v336_v32 = vadd.f32 %v324_v22, %v300_v28  ;;  %346 = vst.msk [vmem:[%s761_s27 + $0x40] sm:$0xff] %vm260_vm0, %v334_v29 }
  0x40   : > { %347 = vst.msk [vmem:[%s761_s27 + $0x48] sm:$0xff] %vm260_vm0, %v335_v30  ;;  %v337_v33 = vadd.f32 %v325_v26, %v301_v31  ;;  %p570_p8 = pnand %p569_p7, %p563_p4 }
  0x41   : > { %348 = vst.msk [vmem:[%s761_s27 + $0x50] sm:$0xff] %vm260_vm0, %v336_v32 }
  0x42   : > { %349 = vst.msk [vmem:[%s761_s27 + $0x58] sm:$0xff] %vm260_vm0, %v337_v33 }
  0x43   : > { %573 = shalt.err (!%p570_p8)
}
  0x44   : > { %s574_s8 = scalar_lea.hbm %s802_s9, 1536  ;;  %s578_s17 = scalar_lea.hbm %s861_s4, 3072 }
  0x45   : > { %p575_p9 = scmp.ne.s32.totalorder %s802_s9, %s574_s8  ;;  %p579_p0 = scmp.lt.u32.totalorder %s802_s9, %s861_s4 }
  0x46   : > { %p580_p1 = scmp.lt.u32.totalorder %s578_s17, %s574_s8  ;;  %p582_p3 = scmp.lt.u32.totalorder %s574_s8, %s802_s9 }
  0x47   : > { %p576_p12 = pnand %p575_p9, %p696_p10 }
  0x48   : > { %p581_p2 = por %p580_p1, %p579_p0 }
  0x49   : > { %p577_p13 = pneg %p576_p12 }
  0x4a   : > { %p583_p4 = por %p582_p3, %p581_p2 }
  0x4c   : > { %p584_p5 = pnand %p583_p4, %p577_p13 }
  0x4e   : > { %587 = shalt.err (!%p584_p5)
}
  0x4f   : > { %s628_s24 = smov 128   ;;  %s629_s26 = smov 8  }
  0x50   : > { %506 = dma.vmem_to_hbm [thread:$0]  (%p696_p10), %s804_s6, 1536, %s802_s9, %s816_s10, %s628_s24, %s628_s24, %s629_s26  }
  0x51 PF: > { %p512_p6 = scmp.ge.s32.totalorder %s624_s22, 2  ;;  %s399_s27 = sand.u32 1, %s612_s20  }
  0x52   : > { %s400_s5 = scalar_lea.sflag [#allocation5], %s399_s27 }
  0x53   : > { %p509_p7 = pnand %p512_p6, %p700_p11 }
  0x55   : > { %607 = dma.done.wait (!%p509_p7), %s400_s5, 1536  }
  0x56   : > { %609 = vsyncadd (!%p509_p7), %s400_s5, 4294965760  ;;  %p21_p8 = scmp.ge.s32.totalorder %s683_s25, 4   ;;  %s864_s20 = smov %s616_s21 }
  0x57   : > { %s865_s21 = smov %s620_s0  ;;  %s866_s0 = smov %s694_s28 }
  0x58   : > { %s867_s22 = smov %s683_s25  ;;  %23 = sbr.rel (!%p21_p8) target bundleno = 18 (0x12), region = 78 }
  0x5f   :  { %405 = vsyncpa [#allocation5], 1 }
  0x60   :  { %407 = vsyncpa [#allocation5 + $0x1], 1 }

// kernel: nerf_diff_forward.5
= control target key start
LH: loop header
LB: loop body
LE: loop exit
PB: predicated region body
PF: predicated region fallthrough
CT: control target
= control target key end

     0   :  { %s927_s18 = smov 0   ;;  %s929_s19 = smov 0   ;;  %s1081_s0 = inlined_call_operand.vmem [shape: f32[2,3,16,16], index: 0, kind: input, shape index: {}]   ;;  %s1082_s1 = inlined_call_operand.vmem [shape: f32[2,3,16,16], index: 1, kind: input, shape index: {}]   ;;  %s1083_s2 = inlined_call_operand.vmem [shape: f32[2,3,16,16], index: 2, kind: input, shape index: {}]   ;;  %s1084_s3 = inlined_call_operand.vmem [shape: f32[2,3,16,16], index: 3, kind: input, shape index: {}]   ;;  %s1085_s4 = inlined_call_operand.vmem [shape: f32[4,8,8], index: 4, kind: input, shape index: {}]   ;;  %s1086_s5 = inlined_call_operand.vmem [shape: f32[2,8,128], index: 5, kind: output, shape index: {}]  }
   0x1   :  { %s931_s20 = smov 0  }
   0x2 LB: > { %s943_s21 = sadd.s32 4294967295, %s895_s20   ;;  %s946_s22 = sadd.s32 1, %s895_s20   ;;  %s895_s20 = sphi %s931_s20, %s1090_s20   ;;  %s891_s19 = sphi %s929_s19, %s1089_s19   ;;  %s887_s18 = sphi %s927_s18, %s1088_s18  }
   0x3   : > { %s19_s23 = ssub.s32 %s895_s20, %s946_s22  ;;  %s22_s24 = sadd.s32 1, %s891_s19 }
   0x4   : > { %p20_p0 = scmp.eq.s32.totalorder %s19_s23, 0  ;;  %p29_p1 = scmp.ne.s32.totalorder %s891_s19, %s887_s18 }
   0x5   : > { %p30_p2 = scmp.eq.s32.totalorder %s895_s20, 0  ;;  %p829_p4 = scmp.ge.s32.totalorder %s895_s20, 2 }
   0x6   : > { %s955_s25 = scalar_select %p20_p0, %s891_s19, %s22_s24  }
   0x7   : > { %p957_p3 = por %p30_p2, %p29_p1  ;;  %183 = sbr.rel (%p829_p4) target bundleno = 42 (0x2a), region = 20 }
   0xe   : > { %186 = sbr.rel (!%p957_p3) target bundleno = 21 (0x15), region = 24  ;;  %s188_s27 = sand.u32 (%p957_p3), 1, %s891_s19  }
   0xf   : > { %s830_s28 = sshll.u32 (%p957_p3), %s895_s20, 3  ;;  %s838_s29 = smul.u32 (%p957_p3), 48, %s188_s27 }
  0x10   : > { %s192_s7 = scalar_lea.vmem (%p957_p3), %s1081_s0, %s830_s28 }
  0x11   : > { %v230_v0 = vld [vmem:[%s192_s7] sm:$0xff] (%p957_p3)  ;;  %v232_v1 = vld [vmem:[%s192_s7 + $0x10] sm:$0xff] (%p957_p3)  ;;  %s190_s8 = scalar_lea.vmem (%p957_p3), [#allocation2], %s838_s29 }
  0x12   : > { %v234_v2 = vld [vmem:[%s192_s7 + $0x20] sm:$0xff] (%p957_p3)  ;;  %v236_v3 = vld [vmem:[%s192_s7 + $0x30] sm:$0xff] (%p957_p3)  ;;  %231 = vst [vmem:[%s190_s8] sm:$0xff] (%p957_p3), %v230_v0  ;;  %233 = vst [vmem:[%s190_s8 + $0x8] sm:$0xff] (%p957_p3), %v232_v1 }
  0x13   : > { %v238_v4 = vld [vmem:[%s192_s7 + $0x40] sm:$0xff] (%p957_p3)  ;;  %v240_v5 = vld [vmem:[%s192_s7 + $0x50] sm:$0xff] (%p957_p3)  ;;  %235 = vst [vmem:[%s190_s8 + $0x10] sm:$0xff] (%p957_p3), %v234_v2  ;;  %237 = vst [vmem:[%s190_s8 + $0x18] sm:$0xff] (%p957_p3), %v236_v3 }
  0x14   : > { %239 = vst [vmem:[%s190_s8 + $0x20] sm:$0xff] (%p957_p3), %v238_v4  ;;  %241 = vst [vmem:[%s190_s8 + $0x28] sm:$0xff] (%p957_p3), %v240_v5 }
  0x15 PF: > { %247 = sbr.rel (!%p957_p3) target bundleno = 28 (0x1c), region = 62  ;;  %s249_s9 = sand.u32 (%p957_p3), 1, %s891_s19  }
  0x16   : > { %s831_s10 = sshll.u32 (%p957_p3), %s895_s20, 3  ;;  %s839_s11 = smul.u32 (%p957_p3), 48, %s249_s9 }
  0x17   : > { %s253_s14 = scalar_lea.vmem (%p957_p3), %s1082_s1, %s831_s10 }
  0x18   : > { %v291_v6 = vld [vmem:[%s253_s14] sm:$0xff] (%p957_p3)  ;;  %v293_v7 = vld [vmem:[%s253_s14 + $0x10] sm:$0xff] (%p957_p3)  ;;  %s251_s15 = scalar_lea.vmem (%p957_p3), [#allocation3], %s839_s11 }
  0x19   : > { %v295_v8 = vld [vmem:[%s253_s14 + $0x20] sm:$0xff] (%p957_p3)  ;;  %v297_v9 = vld [vmem:[%s253_s14 + $0x30] sm:$0xff] (%p957_p3)  ;;  %292 = vst [vmem:[%s251_s15] sm:$0xff] (%p957_p3), %v291_v6  ;;  %294 = vst [vmem:[%s251_s15 + $0x8] sm:$0xff] (%p957_p3), %v293_v7 }
  0x1a   : > { %v299_v10 = vld [vmem:[%s253_s14 + $0x40] sm:$0xff] (%p957_p3)  ;;  %v301_v11 = vld [vmem:[%s253_s14 + $0x50] sm:$0xff] (%p957_p3)  ;;  %296 = vst [vmem:[%s251_s15 + $0x10] sm:$0xff] (%p957_p3), %v295_v8  ;;  %298 = vst [vmem:[%s251_s15 + $0x18] sm:$0xff] (%p957_p3), %v297_v9 }
  0x1b   : > { %300 = vst [vmem:[%s251_s15 + $0x20] sm:$0xff] (%p957_p3), %v299_v10  ;;  %302 = vst [vmem:[%s251_s15 + $0x28] sm:$0xff] (%p957_p3), %v301_v11 }
  0x1c PF: > { %308 = sbr.rel (!%p957_p3) target bundleno = 35 (0x23), region = 100  ;;  %s310_s16 = sand.u32 (%p957_p3), 1, %s891_s19  }
  0x1d   : > { %s832_s17 = sshll.u32 (%p957_p3), %s895_s20, 3  ;;  %s840_s23 = smul.u32 (%p957_p3), 48, %s310_s16 }
  0x1e   : > { %s314_s28 = scalar_lea.vmem (%p957_p3), %s1083_s2, %s832_s17 }
  0x1f   : > { %v352_v12 = vld [vmem:[%s314_s28] sm:$0xff] (%p957_p3)  ;;  %v354_v13 = vld [vmem:[%s314_s28 + $0x10] sm:$0xff] (%p957_p3)  ;;  %s312_s29 = scalar_lea.vmem (%p957_p3), [#allocation4], %s840_s23 }
  0x20   : > { %v356_v14 = vld [vmem:[%s314_s28 + $0x20] sm:$0xff] (%p957_p3)  ;;  %v358_v15 = vld [vmem:[%s314_s28 + $0x30] sm:$0xff] (%p957_p3)  ;;  %353 = vst [vmem:[%s312_s29] sm:$0xff] (%p957_p3), %v352_v12  ;;  %355 = vst [vmem:[%s312_s29 + $0x8] sm:$0xff] (%p957_p3), %v354_v13 }
  0x21   : > { %v360_v16 = vld [vmem:[%s314_s28 + $0x40] sm:$0xff] (%p957_p3)  ;;  %v362_v17 = vld [vmem:[%s314_s28 + $0x50] sm:$0xff] (%p957_p3)  ;;  %357 = vst [vmem:[%s312_s29 + $0x10] sm:$0xff] (%p957_p3), %v356_v14  ;;  %359 = vst [vmem:[%s312_s29 + $0x18] sm:$0xff] (%p957_p3), %v358_v15 }
  0x22   : > { %361 = vst [vmem:[%s312_s29 + $0x20] sm:$0xff] (%p957_p3), %v360_v16  ;;  %363 = vst [vmem:[%s312_s29 + $0x28] sm:$0xff] (%p957_p3), %v362_v17 }
  0x23 PF: > { %369 = sbr.rel (!%p957_p3) target bundleno = 42 (0x2a), region = 138  ;;  %s371_s30 = sand.u32 (%p957_p3), 1, %s891_s19  }
  0x24   : > { %s833_s6 = sshll.u32 (%p957_p3), %s895_s20, 3  ;;  %s841_s7 = smul.u32 (%p957_p3), 48, %s371_s30 }
  0x25   : > { %s375_s10 = scalar_lea.vmem (%p957_p3), %s1084_s3, %s833_s6 }
  0x26   : > { %v413_v18 = vld [vmem:[%s375_s10] sm:$0xff] (%p957_p3)  ;;  %v415_v19 = vld [vmem:[%s375_s10 + $0x10] sm:$0xff] (%p957_p3)  ;;  %s373_s11 = scalar_lea.vmem (%p957_p3), [#allocation5], %s841_s7 }
  0x27   : > { %v417_v20 = vld [vmem:[%s375_s10 + $0x20] sm:$0xff] (%p957_p3)  ;;  %v419_v21 = vld [vmem:[%s375_s10 + $0x30] sm:$0xff] (%p957_p3)  ;;  %414 = vst [vmem:[%s373_s11] sm:$0xff] (%p957_p3), %v413_v18  ;;  %416 = vst [vmem:[%s373_s11 + $0x8] sm:$0xff] (%p957_p3), %v415_v19 }
  0x28   : > { %v421_v22 = vld [vmem:[%s375_s10 + $0x40] sm:$0xff] (%p957_p3)  ;;  %v423_v23 = vld [vmem:[%s375_s10 + $0x50] sm:$0xff] (%p957_p3)  ;;  %418 = vst [vmem:[%s373_s11 + $0x10] sm:$0xff] (%p957_p3), %v417_v20  ;;  %420 = vst [vmem:[%s373_s11 + $0x18] sm:$0xff] (%p957_p3), %v419_v21 }
  0x29   : > { %422 = vst [vmem:[%s373_s11 + $0x20] sm:$0xff] (%p957_p3), %v421_v22  ;;  %424 = vst [vmem:[%s373_s11 + $0x28] sm:$0xff] (%p957_p3), %v423_v23 }
  0x2a PF: > { %p834_p5 = scmp.ge.s32.totalorder %s895_s20, 1  ;;  %p429_p6 = scmp.lt.s32.totalorder %s895_s20, 3 }
  0x2c   : > { %p430_p7 = pnand %p834_p5, %p429_p6 }
  0x2d   : > { %v679_v24 = vld [vmem:[%s1085_s4] sm:$0xff] (!%p430_p7)  ;;  %v680_v25 = vld [vmem:[%s1085_s4 + $0x8] sm:$0xff] (!%p430_p7)  ;;  %v681_v26 = vld [vmem:[%s1085_s4 + $0x10] sm:$0xff] (!%p430_p7)  ;;  %vm683_vm0 = vcmask (!%p430_p7), 64512   ;;  %s436_s17 = sand.u32 (!%p430_p7), 1, %s887_s18   ;;  %vm511_vm1 = vcmask (!%p430_p7), 130048  }
  0x2e   : > { %433 = sbr.rel (%p430_p7) target bundleno = 302 (0x12e), region = 176  ;;  %v682_v27 = vld [vmem:[%s1085_s4 + $0x18] sm:$0xff] (!%p430_p7)  ;;  %v684_v28 = vsel (!%p430_p7), %vm683_vm0, %v679_v24, 0.0  ;;  %v685_v29 = vsel (!%p430_p7), %vm683_vm0, %v680_v25, 0.0  ;;  %v687_v30 = vsel (!%p430_p7), %vm683_vm0, %v681_v26, 0.0  ;;  %p495_p8 = scmp.lt.s32.totalorder (!%p430_p7), %s943_s21, 1 }
  0x2f   : > { %s1005_s20 = smul.u32 (!%p430_p7), 48, %s436_s17  ;;  %v686_v31 = vadd.f32 (!%p430_p7), %v685_v29, %v684_v28  ;;  %v689_v32 = vsel (!%p430_p7), %vm683_vm0, %v682_v27, 0.0  ;;  %p678_p9 = scmp.eq.s32.totalorder (!%p430_p7), %s943_s21, 0 }
  0x31   : > { %v688_v33 = vadd.f32 (!%p430_p7), %v687_v30, %v686_v31  ;;  %s438_s27 = scalar_lea.vmem (!%p430_p7), [#allocation2], %s1005_s20  ;;  %s452_s18 = scalar_lea.vmem (!%p430_p7), [#allocation4], %s1005_s20 }
  0x32   : > { %v499_v34 = vld [vmem:[%s438_s27] sm:$0xff] (!%p430_p7)  ;;  %v500_v35 = vld [vmem:[%s438_s27 + $0x8] sm:$0xff] (!%p430_p7)  ;;  %v501_v36 = vld [vmem:[%s438_s27 + $0x10] sm:$0xff] (!%p430_p7)  ;;  %s445_s28 = scalar_lea.vmem (!%p430_p7), [#allocation3], %s1005_s20  ;;  %s459_s29 = scalar_lea.vmem (!%p430_p7), [#allocation5], %s1005_s20 }
  0x33   : > { %v502_v37 = vld [vmem:[%s438_s27 + $0x18] sm:$0xff] (!%p430_p7)  ;;  %v503_v38 = vld [vmem:[%s438_s27 + $0x20] sm:$0xff] (!%p430_p7)  ;;  %v504_v39 = vld [vmem:[%s438_s27 + $0x28] sm:$0xff] (!%p430_p7)  ;;  %v512_v40 = vsel (!%p430_p7), %vm511_vm1, %v499_v34, 0.0  ;;  %v515_v41 = vsel (!%p430_p7), %vm511_vm1, %v500_v35, 0.0  ;;  %v518_v42 = vsel (!%p430_p7), %vm511_vm1, %v501_v36, 0.0  ;;  %v521_v43 = vmul.f32 (!%p430_p7), %v499_v34, %v499_v34 }
  0x34   : > { %v690_v44 = vadd.f32 (!%p430_p7), %v689_v32, %v688_v33  ;;  %v513_v45 = vsel (!%p430_p7), %vm511_vm1, %v502_v37, 0.0  ;;  %v516_v46 = vsel (!%p430_p7), %vm511_vm1, %v503_v38, 0.0  ;;  %v519_v47 = vsel (!%p430_p7), %vm511_vm1, %v504_v39, 0.0  ;;  %v505_v52 = vld [vmem:[%s452_s18] sm:$0xff] (!%p430_p7)  ;;  %v508_v53 = vld [vmem:[%s452_s18 + $0x18] sm:$0xff] (!%p430_p7)  ;;  %v506_v62 = vld [vmem:[%s452_s18 + $0x8] sm:$0xff] (!%p430_p7) }
  0x35   : > { %v514_v48 = vadd.f32 %v513_v45, %v512_v40  ;;  %v517_v49 = vadd.f32 %v516_v46, %v515_v41  ;;  %v520_v50 = vadd.f32 %v519_v47, %v518_v42  ;;  %v522_v51 = vmul.f32 %v500_v35, %v500_v35  ;;  %v507_v3 = vld [vmem:[%s452_s18 + $0x10] sm:$0xff]  ;;  %v509_v4 = vld [vmem:[%s452_s18 + $0x20] sm:$0xff]  ;;  %v510_v5 = vld [vmem:[%s452_s18 + $0x28] sm:$0xff]  ;;  %s496_s6 = scalar_select %p495_p8, %s943_s21, 1 }
  0x36   : > { %691 = vadd.xlane.f32.xlu1 %v690_v44  ;;  %v523_v54 = vmul.f32 %v501_v36, %v501_v36  ;;  %v524_v55 = vmul.f32 %v502_v37, %v502_v37  ;;  %v525_v56 = vmul.f32 %v503_v38, %v503_v38  ;;  %v526_v57 = vmul.f32 %v504_v39, %v504_v39  ;;  %v589_v34 = vld [vmem:[%s445_s28] sm:$0xff]  ;;  %v592_v35 = vld [vmem:[%s445_s28 + $0x18] sm:$0xff]  ;;  %v590_v44 = vld [vmem:[%s445_s28 + $0x8] sm:$0xff] }
  0x37   : > { %v527_v58 = vsel %vm511_vm1, %v521_v43, 0.0  ;;  %v530_v59 = vsel %vm511_vm1, %v522_v51, 0.0  ;;  %v536_v60 = vsel %vm511_vm1, %v505_v52, 0.0  ;;  %v537_v61 = vsel %vm511_vm1, %v508_v53, 0.0  ;;  %v591_v45 = vld [vmem:[%s445_s28 + $0x10] sm:$0xff]  ;;  %v593_v46 = vld [vmem:[%s445_s28 + $0x20] sm:$0xff] }
  0x38   : > { %v528_v63 = vsel %vm511_vm1, %v524_v55, 0.0  ;;  %v531_v0 = vsel %vm511_vm1, %v525_v56, 0.0  ;;  %v533_v1 = vsel %vm511_vm1, %v523_v54, 0.0  ;;  %v534_v2 = vsel %vm511_vm1, %v526_v57, 0.0  ;;  %v594_v54 = vld [vmem:[%s445_s28 + $0x28] sm:$0xff]  ;;  %s835_s8 = sshll.u32 %s496_s6, 3 }
  0x39   : > { %v529_v6 = vadd.f32 %v528_v63, %v527_v58  ;;  %v532_v7 = vadd.f32 %v531_v0, %v530_v59  ;;  %v535_v8 = vadd.f32 %v534_v2, %v533_v1  ;;  %v538_v9 = vadd.f32 %v537_v61, %v536_v60  ;;  %s498_s26 = scalar_lea.vmem %s1086_s5, %s835_s8 }
  0x3a   : > { %v539_v10 = vsel %vm511_vm1, %v506_v62, 0.0  ;;  %v540_v11 = vsel %vm511_vm1, %v509_v4, 0.0  ;;  %v542_v12 = vsel %vm511_vm1, %v507_v3, 0.0  ;;  %v543_v13 = vsel %vm511_vm1, %v510_v5, 0.0 }
  0x3b   : > { %v541_v14 = vadd.f32 %v540_v11, %v539_v10  ;;  %v544_v15 = vadd.f32 %v543_v13, %v542_v12  ;;  %v545_v16 = vmul.f32 %v505_v52, %v505_v52  ;;  %v546_v17 = vmul.f32 %v506_v62, %v506_v62  ;;  %v596_v13 = vld [vmem:[%s459_s29 + $0x8] sm:$0xff] }
  0x3c   : > { %v547_v18 = vmul.f32 %v507_v3, %v507_v3  ;;  %v548_v19 = vmul.f32 %v508_v53, %v508_v53  ;;  %v549_v20 = vmul.f32 %v509_v4, %v509_v4  ;;  %v550_v21 = vmul.f32 %v510_v5, %v510_v5 }
  0x3d   : > { %v551_v22 = vsel %vm511_vm1, %v545_v16, 0.0  ;;  %v554_v23 = vsel %vm511_vm1, %v546_v17, 0.0  ;;  %v566_v24 = vmul.f32 %v538_v9, %v514_v48  ;;  %v567_v25 = vmul.f32 %v541_v14, %v517_v49  ;;  %v595_v9 = vld [vmem:[%s459_s29] sm:$0xff]  ;;  %v598_v14 = vld [vmem:[%s459_s29 + $0x18] sm:$0xff] }
  0x3e   : > { %v552_v26 = vsel %vm511_vm1, %v548_v19, 0.0  ;;  %v555_v27 = vsel %vm511_vm1, %v549_v20, 0.0  ;;  %v557_v28 = vsel %vm511_vm1, %v547_v18, 0.0  ;;  %v558_v29 = vsel %vm511_vm1, %v550_v21, 0.0  ;;  %v597_v20 = vld [vmem:[%s459_s29 + $0x10] sm:$0xff]  ;;  %v599_v21 = vld [vmem:[%s459_s29 + $0x20] sm:$0xff] }
  0x3f   : > { %v553_v30 = vadd.f32 %v552_v26, %v551_v22  ;;  %v556_v31 = vadd.f32 %v555_v27, %v554_v23  ;;  %v559_v32 = vadd.f32 %v558_v29, %v557_v28  ;;  %v568_v33 = vmul.f32 %v544_v15, %v520_v50  ;;  %v600_v22 = vld [vmem:[%s459_s29 + $0x28] sm:$0xff] }
  0x40   : > { %v569_v36 = vmul.f32 2.0, %v566_v24  ;;  %v570_v37 = vmul.f32 2.0, %v567_v25  ;;  %v601_v38 = vsel %vm511_vm1, %v589_v34, 0.0  ;;  %v602_v39 = vsel %vm511_vm1, %v592_v35, 0.0 }
  0x41   : > { %v560_v40 = vadd.f32 %v553_v30, %v529_v6  ;;  %v561_v41 = vadd.f32 %v556_v31, %v532_v7  ;;  %v562_v42 = vadd.f32 %v559_v32, %v535_v8  ;;  %v571_v43 = vmul.f32 2.0, %v568_v33 }
  0x42   : > { %v603_v47 = vadd.f32 %v602_v39, %v601_v38  ;;  %v604_v48 = vsel %vm511_vm1, %v590_v44, 0.0  ;;  %v605_v49 = vsel %vm511_vm1, %v593_v46, 0.0  ;;  %v607_v50 = vsel %vm511_vm1, %v591_v45, 0.0 }
  0x43   : > { %v563_v51 = vmul.f32 2.0, %v560_v40  ;;  %v564_v52 = vmul.f32 2.0, %v561_v41  ;;  %v565_v53 = vmul.f32 2.0, %v562_v42  ;;  %v606_v55 = vadd.f32 %v605_v49, %v604_v48 }
  0x44   : > { %v608_v56 = vsel %vm511_vm1, %v594_v54, 0.0  ;;  %v610_v57 = vmul.f32 %v589_v34, %v589_v34  ;;  %v611_v58 = vmul.f32 %v590_v44, %v590_v44  ;;  %v612_v59 = vmul.f32 %v591_v45, %v591_v45 }
  0x45   : > { %v572_v60 = vsub.f32 %v563_v51, %v569_v36  ;;  %v573_v61 = vsub.f32 %v564_v52, %v570_v37  ;;  %v574_v62 = vsub.f32 %v565_v53, %v571_v43  ;;  %v609_v63 = vadd.f32 %v608_v56, %v607_v50 }
  0x46   : > { %v613_v0 = vmul.f32 %v592_v35, %v592_v35  ;;  %v614_v1 = vmul.f32 %v593_v46, %v593_v46  ;;  %v615_v2 = vmul.f32 %v594_v54, %v594_v54  ;;  %v616_v3 = vsel %vm511_vm1, %v610_v57, 0.0 }
  0x47   : > { %v575_v4 = vsel %vm511_vm1, %v572_v60, 0.0  ;;  %v576_v5 = vsel %vm511_vm1, %v573_v61, 0.0  ;;  %v578_v6 = vsel %vm511_vm1, %v574_v62, 0.0  ;;  %v619_v7 = vsel %vm511_vm1, %v611_v58, 0.0 }
  0x48   : > { %v577_v8 = vadd.f32 %v576_v5, %v575_v4  ;;  %v617_v10 = vsel %vm511_vm1, %v613_v0, 0.0  ;;  %v620_v11 = vsel %vm511_vm1, %v614_v1, 0.0  ;;  %v622_v12 = vsel %vm511_vm1, %v612_v59, 0.0 }
  0x49   : > { %v618_v15 = vadd.f32 %v617_v10, %v616_v3  ;;  %v621_v16 = vadd.f32 %v620_v11, %v619_v7  ;;  %v623_v17 = vsel %vm511_vm1, %v615_v2, 0.0  ;;  %v625_v18 = vsel %vm511_vm1, %v595_v9, 0.0 }
  0x4a   : > { %v579_v19 = vadd.f32 %v578_v6, %v577_v8  ;;  %v624_v23 = vadd.f32 %v623_v17, %v622_v12  ;;  %v626_v24 = vsel %vm511_vm1, %v598_v14, 0.0  ;;  %v628_v25 = vsel %vm511_vm1, %v596_v13, 0.0 }
  0x4b   : > { %v627_v26 = vadd.f32 %v626_v24, %v625_v18  ;;  %v629_v27 = vsel %vm511_vm1, %v599_v21, 0.0  ;;  %v631_v28 = vsel %vm511_vm1, %v597_v20, 0.0  ;;  %v632_v29 = vsel %vm511_vm1, %v600_v22, 0.0 }
  0x4c   : > { %580 = vadd.xlane.f32.xlu0 %v579_v19  ;;  %v630_v30 = vadd.f32 %v629_v27, %v628_v25  ;;  %v633_v31 = vadd.f32 %v632_v29, %v631_v28  ;;  %v634_v32 = vmul.f32 %v595_v9, %v595_v9  ;;  %v635_v33 = vmul.f32 %v596_v13, %v596_v13 }
  0x4d   : > { %v636_v34 = vmul.f32 %v597_v20, %v597_v20  ;;  %v637_v35 = vmul.f32 %v598_v14, %v598_v14  ;;  %v638_v36 = vmul.f32 %v599_v21, %v599_v21  ;;  %v639_v37 = vmul.f32 %v600_v22, %v600_v22 }
  0x4e   : > { %v640_v38 = vsel %vm511_vm1, %v634_v32, 0.0  ;;  %v643_v39 = vsel %vm511_vm1, %v635_v33, 0.0  ;;  %v655_v40 = vmul.f32 %v627_v26, %v603_v47  ;;  %v656_v41 = vmul.f32 %v630_v30, %v606_v55 }
  0x4f   : > { %v641_v42 = vsel %vm511_vm1, %v637_v35, 0.0  ;;  %v644_v43 = vsel %vm511_vm1, %v638_v36, 0.0  ;;  %v646_v44 = vsel %vm511_vm1, %v636_v34, 0.0  ;;  %v647_v45 = vsel %vm511_vm1, %v639_v37, 0.0 }
  0x50   : > { %v642_v46 = vadd.f32 %v641_v42, %v640_v38  ;;  %v645_v48 = vadd.f32 %v644_v43, %v643_v39  ;;  %v648_v49 = vadd.f32 %v647_v45, %v646_v44  ;;  %v657_v50 = vmul.f32 %v633_v31, %v609_v63 }
  0x51   : > { %v658_v51 = vmul.f32 2.0, %v655_v40  ;;  %v659_v52 = vmul.f32 2.0, %v656_v41  ;;  %v701_v24 = vlaneseq }
  0x52   : > { %v649_v53 = vadd.f32 %v642_v46, %v618_v15  ;;  %v650_v54 = vadd.f32 %v645_v48, %v621_v16  ;;  %v651_v56 = vadd.f32 %v648_v49, %v624_v23  ;;  %v660_v57 = vmul.f32 2.0, %v657_v50 }
  0x53   : > { %v702_v25 = vand.u32 127, %v701_v24 }
  0x54   : > { %v652_v47 = vmul.f32 2.0, %v649_v53  ;;  %v653_v55 = vmul.f32 2.0, %v650_v54  ;;  %v654_v58 = vmul.f32 2.0, %v651_v56 }
  0x55   : > { %vm703_vm2 = vcmp.eq.s32.totalorder %v702_v25, 0  ;;  %vm706_vm3 = vcmp.eq.s32.totalorder %v702_v25, 1  ;;  %vm709_vm4 = vcmp.eq.s32.totalorder %v702_v25, 2 }
  0x56   : > { %v661_v59 = vsub.f32 %v652_v47, %v658_v51  ;;  %v662_v60 = vsub.f32 %v653_v55, %v659_v52  ;;  %v663_v61 = vsub.f32 %v654_v58, %v660_v57 }
  0x58   : > { %v664_v62 = vsel %vm511_vm1, %v661_v59, 0.0  ;;  %v665_v0 = vsel %vm511_vm1, %v662_v60, 0.0  ;;  %v667_v1 = vsel %vm511_vm1, %v663_v61, 0.0 }
  0x59   : > { %v666_v2 = vadd.f32 %v665_v0, %v664_v62 }
  0x5b   : > { %v668_v63 = vadd.f32 %v667_v1, %v666_v2 }
  0x5d   : > { %669 = vadd.xlane.f32.xlu0 %v668_v63 }
  0xc3   : > { %v692_v7 = vpop.xlane.xlu1 %691 }
  0xc4   : > { %v693_v9 = vrot.slane %v692_v7, 4 }
  0xc6   : > { %v694_v12 = vadd.f32 %v693_v9, %v692_v7 }
  0xc8   : > { %v695_v13 = vrot.slane %v694_v12, 2 }
  0xca   : > { %v696_v17 = vadd.f32 %v695_v13, %v694_v12 }
  0xcc   : > { %v697_v20 = vrot.slane %v696_v17, 1 }
  0xce   : > { %v698_v23 = vadd.f32 %v697_v20, %v696_v17 }
  0xd9   : > { %v581_v3 = vpop.xlane.xlu0 %580 }
  0xda   : > { %v582_v4 = vrot.slane %v581_v3, 4 }
  0xdc   : > { %v583_v5 = vadd.f32 %v582_v4, %v581_v3 }
  0xde   : > { %v584_v6 = vrot.slane %v583_v5, 2 }
  0xe0   : > { %v585_v8 = vadd.f32 %v584_v6, %v583_v5 }
  0xe2   : > { %v586_v10 = vrot.slane %v585_v8, 1 }
  0xe4   : > { %v587_v11 = vadd.f32 %v586_v10, %v585_v8 }
  0xe6   : > { %843 = vpush %v587_v11 }
  0xea   : > { %v670_v14 = vpop.xlane.xlu0 %669 }
  0xeb   : > { %v671_v15 = vrot.slane %v670_v14, 4 }
  0xed   : > { %v672_v16 = vadd.f32 %v671_v15, %v670_v14 }
  0xef   : > { %v673_v18 = vrot.slane %v672_v16, 2 }
  0xf1   : > { %v674_v19 = vadd.f32 %v673_v18, %v672_v16 }
  0xf3   : > { %v675_v21 = vrot.slane %v674_v19, 1 }
  0xf5   : > { %v676_v22 = vadd.f32 %v675_v21, %v674_v19 }
  0xf7   : > { %845 = vpush %v676_v22 }
  0xf8   : > { %847 = vpush %v698_v23 }
 0x117   : > { %s844_s30 = spop %843 }
 0x118   : > { %v704_v26 = vstv %s844_s30 }
 0x119   : > { %v705_v27 = vsel %vm703_vm2, %v704_v26, 0.0 }
 0x128   : > { %s846_s7 = spop %845 }
 0x129   : > { %v707_v28 = vstv %s846_s7  ;;  %s848_s9 = spop %847 }
 0x12a   : > { %v708_v29 = vsel %vm706_vm3, %v707_v28, %v705_v27  ;;  %s1092_s9 = smov (!%p678_p9, %s848_s9), 0.0 }
 0x12b   : > { %v710_v30 = vstv %s1092_s9 }
 0x12c   : > { %v711_v31 = vsel %vm709_vm4, %v710_v30, %v708_v29 }
 0x12d   : > { %712 = vst [vmem:[%s498_s26] sm:$0xff] %v711_v31 }
 0x12e PF: > { %p12_p10 = scmp.ge.s32.totalorder %s946_s22, 4   ;;  %s1088_s18 = smov %s891_s19 }
 0x12f   : > { %s1089_s19 = smov %s955_s25  ;;  %s1090_s20 = smov %s946_s22 }
 0x130   :  { %14 = sbr.rel (!%p12_p10) target bundleno = 2 (0x2), region = 251 }

</bundles_post_ra>
